<compile_context>
chip_gen: v7x
topology: tpu7x:2x2x1
jax: 0.10.0
libtpu: 0.0.40
codegen_flags: <defaults>
</compile_context>

<pallas_src>
import jax
import jax.numpy as jnp
from jax.experimental import pallas as pl
from jax.experimental.pallas import tpu as pltpu


def _round_up(x, m):
    return ((x + m - 1) // m) * m


# ----------------------------------------------------------------------------
# Pallas kernel: one (te, K) x (K, tn) matmul tile + bias, stored straight
# into the (B, E, N) output (no post-hoc transpose).
# ----------------------------------------------------------------------------
def patch_embed_kernel(w_ref, b_ref, p_ref, o_ref):
    # w_ref: (te, K)   b_ref: (te, 1) f32   p_ref: (1, K, tn)   o_ref: (1, te, tn)
    acc = jnp.dot(w_ref[...], p_ref[0], preferred_element_type=jnp.float32)
    o_ref[0] = (acc + b_ref[...]).astype(o_ref.dtype)


# ----------------------------------------------------------------------------
# VMEM-aware tile selection.
# ----------------------------------------------------------------------------
def _select_tiles(E, N, Kp, c_bytes, o_bytes, budget_bytes, patch_bufs):
    def footprint(te, tn):
        return (2 * te * Kp * c_bytes           # weight   (double-buffered)
                + 2 * te * 4                    # bias f32 (double-buffered)
                + patch_bufs * Kp * tn * c_bytes  # streamed patches
                + 2 * te * tn * o_bytes)        # output   (double-buffered)

    te_candidates = [E] + [t for t in (2048, 1024, 512, 256, 128, 64, 32, 16, 8)
                           if t < E and E % t == 0]
    Np_aligned = _round_up(N, 128)
    tn_aligned = [t for t in (4096, 2048, 1024, 512, 256, 128)
                  if t <= Np_aligned and Np_aligned % t == 0]

    # Prefer the largest embed tile (weight fully VMEM-resident => patches
    # streamed exactly once), then the largest patch tile.
    for te in te_candidates:
        if footprint(te, N) <= budget_bytes:
            return te, N, N                       # full-N block, no padding
        for tn in tn_aligned:                     # lane-dense 128-multiples
            if footprint(te, tn) <= budget_bytes:
                return te, tn, Np_aligned
    # Last resort: smallest legal tiles (always fits for patch-embed sized K).
    te = 8 if E % 8 == 0 else E
    if Np_aligned >= 128:
        return te, 128, Np_aligned
    return te, N, N


# ----------------------------------------------------------------------------
# Wrapper: im2col glue in plain JAX, GEMM (+bias) in Pallas.
# ----------------------------------------------------------------------------
def distributed_patch_embed_forward(x, weight, bias, patch_size,
                                     compute_dtype=jnp.bfloat16,
                                     vmem_budget_bytes=24 * 1024 * 1024):
    B, C, H, W = x.shape
    ph, pw = patch_size
    assert H % ph == 0 and W % pw == 0, "image must be divisible by patch size"
    Hp, Wp = H // ph, W // pw
    N = Hp * Wp                        # num_patches   (spatial comm size == 1)
    E = weight.shape[0]                # out_chans_local (matmul comm size == 1)
    K = C * ph * pw

    # Pad contraction dim to keep vregs feeding the MXU full (only when it matters).
    Kp = _round_up(K, 128) if K > 128 else _round_up(K, 8)

    # im2col laid out as (B, K, N): the GEMM then writes (B, E, N) directly.
    patches = x.astype(compute_dtype).reshape(B, C, Hp, ph, Wp, pw)
    patches = patches.transpose(0, 1, 3, 5, 2, 4).reshape(B, K, N)
    w_mat = weight.reshape(E, K).astype(compute_dtype)
    if Kp != K:
        patches = jnp.pad(patches, ((0, 0), (0, Kp - K), (0, 0)))
        w_mat = jnp.pad(w_mat, ((0, 0), (0, Kp - K)))
    b_mat = bias.reshape(E, 1).astype(jnp.float32)   # pre-cast: no per-step astype

    c_bytes = jnp.dtype(compute_dtype).itemsize
    o_bytes = jnp.dtype(x.dtype).itemsize
    te, tn, Np = _select_tiles(E, N, Kp, c_bytes, o_bytes, vmem_budget_bytes, 3)
    if Np != N:
        # Rare fallback: N must be tiled but has no 128-aligned divisor.
        patches = jnp.pad(patches, ((0, 0), (0, 0), (0, Np - N)))

    grid = (E // te, B, Np // tn)      # embed axis slowest -> weight stays resident
    n_steps = grid[0] * grid[1] * grid[2]
    patch_bufs = 3 if n_steps >= 3 else 2

    cost = pl.CostEstimate(
        flops=2 * B * N * K * E,
        transcendentals=0,
        bytes_accessed=c_bytes * (B * Np * Kp + E * Kp) + o_bytes * B * E * Np + 4 * E,
    )

    out = pl.pallas_call(
        patch_embed_kernel,
        out_shape=jax.ShapeDtypeStruct((B, E, Np), x.dtype),
        grid_spec=pltpu.PrefetchScalarGridSpec(
            num_scalar_prefetch=0,
            grid=grid,
            in_specs=[
                # weight / bias block index depends only on the slowest axis
                #   -> fully VMEM-resident across all inner (batch, patch) steps
                pl.BlockSpec((te, Kp), lambda e, b, n: (e, 0)),
                pl.BlockSpec((te, 1), lambda e, b, n: (e, 0)),
                # patches are the only streamed operand; deeper buffering hides
                # the HBM fetch behind the short per-tile compute
                pl.BlockSpec((1, Kp, tn), lambda e, b, n: (b, 0, n),
                             pipeline_mode=pl.Buffered(patch_bufs)),
            ],
            out_specs=pl.BlockSpec((1, te, tn), lambda e, b, n: (b, e, n)),
        ),
        compiler_params=pltpu.CompilerParams(
            dimension_semantics=("parallel", "parallel", "parallel"),
            vmem_limit_bytes=32 * 1024 * 1024),
        cost_estimate=cost,
    )(w_mat, b_mat, patches)

    if Np != N:
        out = out[:, :, :N]
    return out                          # (B, E, num_patches) == proj(x).flatten(2)


# ----------------------------------------------------------------------------
# Pure-JAX reference (direct transcription of the PyTorch forward)
# ----------------------------------------------------------------------------
def patch_embed_reference(x, weight, bias, patch_size):
    out = jax.lax.conv_general_dilated(
        x, weight,
        window_strides=patch_size,
        padding="VALID",
        dimension_numbers=("NCHW", "OIHW", "NCHW"),
    )
    out = out + bias.reshape(1, -1, 1, 1)
    B, E, Hp, Wp = out.shape
    return out.reshape(B, E, Hp * Wp)


if __name__ == "__main__":
    # small config consistent with the module (comm sizes == 1)
    B = 2
    in_chans = 4
    img_size = (16, 16)
    patch_size = (4, 4)
    embed_dim = 32
    scale = 0.02

    key = jax.random.PRNGKey(0)
    kx, kw, kb = jax.random.split(key, 3)

    x = jax.random.normal(kx, (B, in_chans, img_size[0], img_size[1]),
                          dtype=jnp.float32)
    weight = scale * jax.random.normal(
        kw, (embed_dim, in_chans, patch_size[0], patch_size[1]), jnp.float32)
    bias = scale * jax.random.normal(kb, (embed_dim,), jnp.float32)

    ref = jax.block_until_ready(patch_embed_reference(x, weight, bias, patch_size))
    num_patches = (img_size[0] // patch_size[0]) * (img_size[1] // patch_size[1])

    # Default (performance) path: bf16 MXU compute, f32 accumulation.
    out_bf16 = jax.block_until_ready(
        distributed_patch_embed_forward(x, weight, bias, patch_size))
    assert out_bf16.shape == (B, embed_dim, num_patches), out_bf16.shape
    assert out_bf16.dtype == x.dtype
    assert jnp.allclose(out_bf16, ref, atol=2e-2, rtol=2e-2), (
        float(jnp.max(jnp.abs(out_bf16 - ref))))

    # Full-precision path: f32 compute, tight tolerance.
    out_f32 = jax.block_until_ready(
        distributed_patch_embed_forward(x, weight, bias, patch_size,
                                        compute_dtype=jnp.float32))
    assert out_f32.shape == (B, embed_dim, num_patches), out_f32.shape
    assert out_f32.dtype == x.dtype
    assert jnp.allclose(out_f32, ref, atol=1e-4, rtol=1e-4), (
        float(jnp.max(jnp.abs(out_f32 - ref))))

    print("KERNEL_OK")
</pallas_src>

<mosaic_0001>
module attributes {stable_mosaic.version = 11 : i64} {
  func.func @patch_embed_kernel(%arg0: i32, %arg1: i32, %arg2: i32, %arg3: memref<32x64xbf16, #tpu.memory_space<vmem>>, %arg4: memref<32x1xf32, #tpu.memory_space<vmem>>, %arg5: memref<1x64x16xbf16, #tpu.memory_space<vmem>>, %arg6: memref<1x32x16xf32, #tpu.memory_space<vmem>>) attributes {dimension_semantics = [#tpu.dimension_semantics<parallel>, #tpu.dimension_semantics<parallel>, #tpu.dimension_semantics<parallel>], iteration_bounds = array<i64: 1, 2, 1>, scalar_prefetch = 0 : i64, scratch_operands = 0 : i64, tpu.core_type = #tpu.core_type<tc>, window_params = [{transform_indices = @transform_0, window_bounds = array<i64: 32, 64>}, {transform_indices = @transform_1, window_bounds = array<i64: 32, 1>}, {pipeline_mode = #tpu.pipeline_mode<double_buffered>, transform_indices = @transform_2, window_bounds = array<i64: 1, 64, 16>}, {transform_indices = @transform_3, window_bounds = array<i64: 1, 32, 16>}]} {
    %c0 = arith.constant 0 : index
    %c0_0 = arith.constant 0 : index
    %0 = vector.load %arg3[%c0, %c0_0] : memref<32x64xbf16, #tpu.memory_space<vmem>>, vector<32x64xbf16>
    %c0_1 = arith.constant 0 : index
    %c0_2 = arith.constant 0 : index
    %c0_3 = arith.constant 0 : index
    %1 = vector.load %arg5[%c0_1, %c0_2, %c0_3] : memref<1x64x16xbf16, #tpu.memory_space<vmem>>, vector<1x64x16xbf16>
    %2 = vector.shape_cast %1 : vector<1x64x16xbf16> to vector<64x16xbf16>
    %cst = arith.constant dense<0.000000e+00> : vector<32x16xf32>
    %3 = tpu.matmul %0, %2, %cst {dimension_numbers = #tpu.dot_dimension_numbers<[1], [0], [0], [1], [0, 0, 1, 1], [], []>} : vector<32x64xbf16>, vector<64x16xbf16>, vector<32x16xf32> -> vector<32x16xf32>
    %c0_4 = arith.constant 0 : index
    %c0_5 = arith.constant 0 : index
    %4 = vector.load %arg4[%c0_4, %c0_5] : memref<32x1xf32, #tpu.memory_space<vmem>>, vector<32x1xf32>
    %5 = vector.broadcast %4 : vector<32x1xf32> to vector<32x16xf32>
    %6 = arith.addf %3, %5 : vector<32x16xf32>
    %c0_6 = arith.constant 0 : index
    %c0_7 = arith.constant 0 : index
    %c0_8 = arith.constant 0 : index
    %7 = vector.load %arg6[%c0_6, %c0_7, %c0_8] : memref<1x32x16xf32, #tpu.memory_space<vmem>>, vector<1x32x16xf32>
    %8 = vector.shape_cast %7 : vector<1x32x16xf32> to vector<32x16xf32>
    %9 = vector.shape_cast %6 : vector<32x16xf32> to vector<1x32x16xf32>
    tpu.vector_store %arg6[%c0_6, %c0_7, %c0_8], %9 {strides = array<i32>} : memref<1x32x16xf32, #tpu.memory_space<vmem>>, vector<1x32x16xf32>,
    return
  }
  func.func @transform_0(%arg0: i32, %arg1: i32, %arg2: i32) -> (i32, i32) {
    %c0_i32 = arith.constant 0 : i32
    %c0_i32_0 = arith.constant 0 : i32
    return %arg0, %c0_i32 : i32, i32
  }
  func.func @transform_1(%arg0: i32, %arg1: i32, %arg2: i32) -> (i32, i32) {
    %c0_i32 = arith.constant 0 : i32
    %c0_i32_0 = arith.constant 0 : i32
    return %arg0, %c0_i32 : i32, i32
  }
  func.func @transform_2(%arg0: i32, %arg1: i32, %arg2: i32) -> (i32, i32, i32) {
    %c0_i32 = arith.constant 0 : i32
    %c0_i32_0 = arith.constant 0 : i32
    return %arg1, %c0_i32, %arg2 : i32, i32, i32
  }
  func.func @transform_3(%arg0: i32, %arg1: i32, %arg2: i32) -> (i32, i32, i32) {
    %c0_i32 = arith.constant 0 : i32
    return %arg1, %arg0, %arg2 : i32, i32, i32
  }
}

</mosaic_0001>

<bundles_post_ra>
// kernel: tpu_custom_call.1
= control target key start
LH: loop header
LB: loop body
LE: loop exit
PB: predicated region body
PF: predicated region fallthrough
CT: control target
= control target key end

     0   :  { %s645_s12 = smov 0   ;;  %s647_s13 = smov 0   ;;  %s701_s0 = inlined_call_operand.vmem [shape: bf16[32,64], index: 0, kind: input, shape index: {}]   ;;  %s702_s1 = inlined_call_operand.vmem [shape: f32[32,1], index: 1, kind: input, shape index: {}]   ;;  %s703_s2 = inlined_call_operand.vmem [shape: bf16[2,64,16], index: 2, kind: input, shape index: {}]   ;;  %s704_s3 = inlined_call_operand.vmem [shape: f32[2,32,16], index: 3, kind: output, shape index: {}]  }
   0x1   :  { %s649_s14 = smov 0  }
   0x2 LB: > { %s28_s15 = sadd.s32 1, %s618_s13  ;;  %p532_p0 = scmp.ge.s32.totalorder %s622_s14, 1  ;;  %s622_s14 = sphi %s649_s14, %s13_s14   ;;  %s618_s13 = sphi %s647_s13, %s706_s13   ;;  %s614_s12 = sphi %s645_s12, %s705_s12  }
   0x3   : > { %p30_p1 = scmp.ge.s32.totalorder %s28_s15, 2  ;;  %p187_p2 = scmp.lt.s32.totalorder %s622_s14, 3 }
   0x5   : > { %s708_s15 = smov (%p30_p1, %s28_s15), 0  ;;  %p188_p3 = pnand %p532_p0, %p187_p2 }
   0x6   : > { %p243_p4 = scmp.lt.s32.totalorder (!%p188_p3), %s614_s12, 1  ;;  %v598_v0 = vld [vmem:[%s701_s0] sm:$0xff] (!%p188_p3)   ;;  %vm335_vm0 = vcmask (!%p188_p3), 523264   ;;  %v279_v1 = vld [vmem:[%s702_s1 + $0x10] sm:$0xff] (!%p188_p3)  ;;  %v624_v3 = vmov (!%p188_p3), 0   ;;  %v280_v4 = vld [vmem:[%s702_s1 + $0x18] sm:$0xff] (!%p188_p3) }
   0x7   : > { %191 = sbr.rel (%p188_p3) target bundleno = 252 (0xfc), region = 32  ;;  %563 = vmatprep.mubr.msk.bf16.mxu0 (!%p188_p3), %vm335_vm0, %v598_v0  ;;  %v277_v2 = vld [vmem:[%s702_s1] sm:$0xff] (!%p188_p3)  ;;  %593 = vset.pattern.permute.xlu1 (!%p188_p3), %v624_v3  ;;  %v278_v5 = vld [vmem:[%s702_s1 + $0x8] sm:$0xff] (!%p188_p3)  ;;  %vm391_vm1 = vcmask (!%p188_p3), 130048  }
   0x8   : > { %592 = vset.pattern.permute.xlu0 (!%p188_p3), %v624_v3  ;;  %293 = vperm.xlu1 (!%p188_p3), %593, %v279_v1   ;;  %v599_v10 = vld [vmem:[%s701_s0 + $0x8] sm:$0xff] (!%p188_p3)  }
   0x9   : > { %283 = vperm.xlu0 (!%p188_p3), %592, %v277_v2  }
   0xc   : > { %298 = vperm.xlu1 (!%p188_p3), %593, %v280_v4  }
   0xd   : > { %288 = vperm.xlu0 (!%p188_p3), %592, %v278_v5  }
   0xe   : > { %s710_s12 = smov (!%p243_p4, %s614_s12), 1 }
   0xf   : > { %s547_s22 = sshll.u32 %s710_s12, 5 }
  0x10   : > { %s250_s25 = scalar_lea.vmem %s703_s2, %s547_s22  ;;  %s262_s7 = scalar_lea.vmem %s704_s3, %s547_s22 }
  0x11   : > { %v594_v6 = vld [vmem:[%s250_s25] sm:$0xff]   ;;  %v595_v7 = vld [vmem:[%s250_s25 + $0x8] sm:$0xff]   ;;  %v596_v8 = vld [vmem:[%s250_s25 + $0x10] sm:$0xff]  }
  0x12   : > { %555 = vmatprep.subr.bf16.mxu0 %v594_v6  ;;  %v597_v9 = vld [vmem:[%s250_s25 + $0x18] sm:$0xff]  }
  0x13   : > { %556 = vmatpush3.bf16.msra.mxu0 %v594_v6 }
  0x14   : > { %557 = vmatprep.subr.bf16.mxu0 %v595_v7 }
  0x17   : > { %558 = vmatpush3.bf16.msra.mxu0 %v595_v7 }
  0x18   : > { %559 = vmatprep.subr.bf16.mxu0 %v596_v8 }
  0x1b   : > { %560 = vmatpush3.bf16.msra.mxu0 %v596_v8 }
  0x1c   : > { %561 = vmatprep.subr.bf16.mxu0 %v597_v9 }
  0x1f   : > { %562 = vmatpush3.bf16.msra.mxu0 %v597_v9 }
  0x22   : > { %564 = vmatmul.mubr.msk.bf16.vlgmr.msra.gmra.mrb[0].mxu0 %vm335_vm0, %v599_v10 }
  0x87   : > { %v294_v11 = vpop.permute.xlu1 %293 }
  0x88   : > { %v284_v12 = vpop.permute.xlu0 %283 }
  0x8b   : > { %v299_v16 = vpop.permute.xlu1 %298 }
  0x8c   : > { %v289_v19 = vpop.permute.xlu0 %288 }
  0xf5   : > { %v565_v13 = vpop.f32.mrb[0].mxu0 }
  0xf6   : > { %v385_v14 = vadd.f32 %v565_v13, %v294_v11  ;;  %v376_v15 = vpop.f32.mrb[1].mxu0 }
  0xf7   : > { %v377_v17 = vadd.f32 %v376_v15, %v284_v12  ;;  %v566_v18 = vpop.f32.mrb[2].mxu0 }
  0xf8   : > { %394 = vst.msk [vmem:[%s262_s7 + $0x10] sm:$0xff] %vm391_vm1, %v385_v14  ;;  %v388_v20 = vadd.f32 %v566_v18, %v299_v16  ;;  %v379_v21 = vpop.f32.mrb[3].mxu0 }
  0xf9   : > { %392 = vst.msk [vmem:[%s262_s7] sm:$0xff] %vm391_vm1, %v377_v17  ;;  %v380_v22 = vadd.f32 %v379_v21, %v289_v19 }
  0xfa   : > { %395 = vst.msk [vmem:[%s262_s7 + $0x18] sm:$0xff] %vm391_vm1, %v388_v20 }
  0xfb   : > { %393 = vst.msk [vmem:[%s262_s7 + $0x8] sm:$0xff] %vm391_vm1, %v380_v22 }
  0xfc PF: > { %s13_s14 = sadd.s32 1, %s622_s14   ;;  %s705_s12 = smov %s618_s13 }
  0xfd   : > { %p10_p5 = scmp.ge.s32.totalorder %s13_s14, 4   ;;  %s706_s13 = smov %s708_s15 }
  0xff   :  { %12 = sbr.rel (!%p10_p5) target bundleno = 2 (0x2), region = 68 }

</bundles_post_ra>
